<compile_context>
chip_gen: v5e
topology: v5e:2x2
jax: 0.10.0
libtpu: 0.0.40
codegen_flags: <defaults>
</compile_context>

<pallas_src>
import numpy as np

import jax
import jax.numpy as jnp
from jax.experimental import pallas as pl
from jax.experimental.pallas import tpu as pltpu

_LANE = 128          # vreg lane width
_F32_SUBLANE = 8     # f32 sublane width
_NEG_FILL = -1e30    # class-pad fill for the last layer's bias


def _round_up(v, m):
    return ((v + m - 1) // m) * m


def _make_mlp_kernel(num_layers, matmul_dtype):
    """Fused MLP forward kernel for a fixed number of layers.

    refs = (x, w_0..w_{L-1}, b_0..b_{L-1}, y_out, prob_out); weights already in matmul_dtype.
    """

    def kernel(*refs):
        x_ref = refs[0]
        w_refs = refs[1:1 + num_layers]
        b_refs = refs[1 + num_layers:1 + 2 * num_layers]
        y_ref = refs[1 + 2 * num_layers]
        prob_ref = refs[2 + 2 * num_layers]

        y = x_ref[...]
        for i in range(num_layers):
            lhs = y if y.dtype == matmul_dtype else y.astype(matmul_dtype)
            # MXU matmul (weights pre-cast in the wrapper), f32 accumulation.
            y = jnp.dot(lhs, w_refs[i][...], preferred_element_type=jnp.float32)
            y = y + b_refs[i][...]          # (1, D) f32 bias broadcast over rows
            if i != num_layers - 1:
                y = jnp.maximum(y, 0.0)     # torch.relu

        # Subtract per-row max, then softmax over dim=1.  Padded class columns already hold
        # ~-1e30 (from the last-layer bias fill), so exp() underflows them to exactly 0.
        row_max = jnp.max(y, axis=1, keepdims=True)
        y_shift = y - row_max
        # TODO(synk): torch casts to double (.double()) before softmax; TPU Pallas has no
        #             float64 support, so the softmax is computed in float32 instead.
        e = jnp.exp(y_shift)
        denom = jnp.sum(e, axis=1, keepdims=True)
        r = pl.reciprocal(denom, approx=True)   # EUP slot (cheap); refine with one
        r = r * (2.0 - denom * r)               # Newton step to keep sum(prob)==1 tight

        y_ref[...] = y_shift                    # self.Y_  (logits - row max); pad cols sliced off
        prob_ref[...] = e * r                   # self.prob

    return kernel


def prepare_params(weights, biases, matmul_dtype=None):
    """Pad / cast the parameters once (hoisted out of the per-call path).

    matmul_dtype=None auto-selects bf16 for non-toy layer widths (>=256) and f32 otherwise.
    """
    num_layers = len(weights)
    dims = [int(weights[0].shape[0])] + [int(w.shape[1]) for w in weights]
    if matmul_dtype is None:
        matmul_dtype = jnp.bfloat16 if max(dims) >= 256 else jnp.float32
    matmul_dtype = np.dtype(matmul_dtype)

    dims_p = [_round_up(d, _LANE) for d in dims]
    c_out, c_pad = dims[-1], dims_p[-1]

    # Weights: lane/feature padded with zeros, stored in matmul_dtype (VMEM-resident copies).
    w_p = tuple(
        jnp.zeros((dims_p[i], dims_p[i + 1]), matmul_dtype)
        .at[:dims[i], :dims[i + 1]].set(weights[i].astype(matmul_dtype))
        for i in range(num_layers)
    )
    # Biases stay f32 (tiny).  Last layer: padded class columns get -1e30 so the softmax
    # zeroes them without any in-kernel masking.
    b_p = []
    for i in range(num_layers):
        if i == num_layers - 1 and c_pad > c_out:
            base = jnp.full((1, c_pad), jnp.float32(_NEG_FILL))
        else:
            base = jnp.zeros((1, dims_p[i + 1]), jnp.float32)
        b_p.append(base.at[:, :dims[i + 1]].set(biases[i].astype(jnp.float32)))
    b_p = tuple(b_p)

    return dict(num_layers=num_layers, dims=dims, dims_p=dims_p, c_out=c_out, c_pad=c_pad,
                matmul_dtype=matmul_dtype, w_p=w_p, b_p=b_p)


def pt_deep_forward(x, params, *, tm_target=1024):
    """Fused Pallas forward pass of PTDeep on pre-padded params.

    Returns (Y_, prob): both (N, num_classes) float32.
    """
    num_layers = params["num_layers"]
    dims, dims_p = params["dims"], params["dims_p"]
    c_out, c_pad = params["c_out"], params["c_pad"]
    matmul_dtype = params["matmul_dtype"]
    w_p, b_p = params["w_p"], params["b_p"]

    n, d_in = x.shape
    assert d_in == dims[0], "input feature dim mismatch"

    w_bytes = matmul_dtype.itemsize
    use_bf16_x = w_bytes < 4
    x_dtype = matmul_dtype if use_bf16_x else np.dtype(jnp.float32)
    x_bytes = x_dtype.itemsize
    # bf16 activations tile as (16, 128) -> TM must be a multiple of 16 in that case.
    row_align = _F32_SUBLANE * (4 // x_bytes)

    # ---- generation-aware VMEM budget ----
    try:
        vmem_cap = int(pltpu.get_tpu_info().vmem_capacity_bytes)
    except Exception:
        vmem_cap = 64 * 1024 * 1024   # conservative fallback (v7x per-TC VMEM)
    vmem_budget = int(0.6 * vmem_cap)

    param_bytes = (sum(dims_p[i] * dims_p[i + 1] for i in range(num_layers)) * w_bytes
                   + sum(dims_p[i + 1] for i in range(num_layers)) * 4)
    d_max = max(dims_p)

    def vmem_estimate(tm_):
        x_tile = 2 * tm_ * dims_p[0] * x_bytes       # double-buffered X tile
        out_tiles = 2 * 2 * tm_ * c_pad * 4          # two double-buffered f32 output tiles
        inter = 3 * tm_ * d_max * 4                  # live-intermediate headroom
        return param_bytes + x_tile + out_tiles + inter   # params are single-buffered

    # ---- row tile: as large as fits VMEM; prefer >= 2 tiles so both v7x TCs get work ----
    n_rounded = _round_up(n, row_align)
    tm = min(_round_up(tm_target, row_align), n_rounded)
    if n_rounded >= 2 * row_align and tm >= n_rounded:
        tm = _round_up(-(-n_rounded // 2), row_align)       # ceil(n/2) -> at least 2 tiles
    tm = max(row_align, (tm // row_align) * row_align)
    while tm > row_align and vmem_estimate(tm) > vmem_budget:
        tm = max(row_align, ((tm // 2) // row_align) * row_align)
    # TODO(synk): if the (bf16) parameters alone exceed ~half the per-TC VMEM, K-tile the widest
    #             layer (pltpu.emit_pipeline over weight chunks) instead of shrinking TM further.

    n_pad = _round_up(n, tm)
    n_tiles = n_pad // tm

    # ---- per-call X padding only (params already padded/cast in prepare_params) ----
    x_p = jnp.zeros((n_pad, dims_p[0]), x_dtype).at[:n, :d_in].set(x.astype(x_dtype))

    kernel = _make_mlp_kernel(num_layers, matmul_dtype)

    # X / outputs: row-tiled blocks.  Weights / biases: full arrays, constant index_map,
    # single-buffered (their block never changes, so a second pipeline buffer is waste).
    in_specs = [pl.BlockSpec((tm, dims_p[0]), lambda i: (i, 0))]
    in_specs += [pl.BlockSpec(w.shape, lambda i: (0, 0), pipeline_mode=pl.Buffered(1))
                 for w in w_p]
    in_specs += [pl.BlockSpec(b.shape, lambda i: (0, 0), pipeline_mode=pl.Buffered(1))
                 for b in b_p]

    out_shape = (
        jax.ShapeDtypeStruct((n_pad, c_pad), jnp.float32),  # Y_
        jax.ShapeDtypeStruct((n_pad, c_pad), jnp.float32),  # prob
    )
    out_specs = (
        pl.BlockSpec((tm, c_pad), lambda i: (i, 0)),
        pl.BlockSpec((tm, c_pad), lambda i: (i, 0)),
    )

    flops = 2 * n_pad * sum(dims_p[i] * dims_p[i + 1] for i in range(num_layers))
    bytes_accessed = n_pad * dims_p[0] * x_bytes + param_bytes + 2 * n_pad * c_pad * 4
    transcendentals = n_pad * c_pad  # exp (+ cheap EUP reciprocal)

    vmem_limit = int(min(vmem_cap, max(2 * vmem_estimate(tm), 32 * 1024 * 1024)))

    fn = pl.pallas_call(
        kernel,
        out_shape=out_shape,
        grid=(n_tiles,),
        in_specs=in_specs,
        out_specs=out_specs,
        compiler_params=pltpu.CompilerParams(
            dimension_semantics=("parallel",),   # row tiles shard across v7x's 2 TCs
            vmem_limit_bytes=vmem_limit,
        ),
        cost_estimate=pl.CostEstimate(
            flops=flops,
            transcendentals=transcendentals,
            bytes_accessed=bytes_accessed,
        ),
    )
    y_p, prob_p = fn(x_p, *w_p, *b_p)

    # Slice back to the true (unpadded) shapes outside the kernel.
    return y_p[:n, :c_out], prob_p[:n, :c_out]


def pt_deep_forward_raw(x, weights, biases, *, matmul_dtype=None, tm_target=1024):
    """Convenience wrapper: pad params and run (use prepare_params + pt_deep_forward in loops)."""
    return pt_deep_forward(x, prepare_params(weights, biases, matmul_dtype),
                           tm_target=tm_target)


def init_params(key, config):
    """Deterministic init mirroring torch.randn for weights/biases."""
    weights, biases = [], []
    for i in range(len(config) - 1):
        key, kw, kb = jax.random.split(key, 3)
        weights.append(
            jax.random.normal(kw, (config[i], config[i + 1]), dtype=jnp.float32))
        biases.append(
            jax.random.normal(kb, (1, config[i + 1]), dtype=jnp.float32))
    return weights, biases


def reference_forward(x, weights, biases):
    """Pure-JAX reference matching the PyTorch forward semantics (f32)."""
    y = x
    n_layers = len(weights)
    for i in range(n_layers):
        y = y @ weights[i] + biases[i]
        if i != n_layers - 1:
            y = jnp.maximum(y, 0.0)
    y = y - jnp.max(y, axis=1, keepdims=True)
    prob = jax.nn.softmax(y, axis=1)
    return y, prob


if __name__ == "__main__":
    # config = [input_dim, hidden, num_classes]
    config = [16, 32, 10]
    batch = 8

    key = jax.random.PRNGKey(0)
    key, kx, kp = jax.random.split(key, 3)
    x = jax.random.normal(kx, (batch, config[0]), dtype=jnp.float32)
    weights, biases = init_params(kp, config)

    # f32-matmul path (exact vs. reference); params padded once, reused across calls.
    params_f32 = prepare_params(weights, biases, matmul_dtype=jnp.float32)
    y_, prob = pt_deep_forward(x, params_f32)
    jax.block_until_ready((y_, prob))

    y_ref, prob_ref = reference_forward(x, weights, biases)
    assert y_.shape == (batch, config[-1]) and prob.shape == (batch, config[-1])
    assert jnp.allclose(y_, y_ref, atol=1e-4, rtol=1e-4), "logits mismatch"
    assert jnp.allclose(prob, prob_ref, atol=1e-5, rtol=1e-4), "prob mismatch"
    assert jnp.allclose(jnp.sum(prob, axis=1), 1.0, atol=1e-5), "softmax not normalized"

    # bf16-matmul path (pre-cast weights, bf16 X tile): smoke/consistency check at toy size.
    params_bf16 = prepare_params(weights, biases, matmul_dtype=jnp.bfloat16)
    y_bf, prob_bf = pt_deep_forward(x, params_bf16)
    jax.block_until_ready((y_bf, prob_bf))
    assert bool(jnp.all(jnp.isfinite(prob_bf))), "bf16 path produced non-finite probs"
    assert jnp.allclose(jnp.sum(prob_bf, axis=1), 1.0, atol=1e-3), "bf16 softmax not normalized"

    print("KERNEL_OK")
</pallas_src>

<mosaic_0001>
module attributes {stable_mosaic.version = 11 : i64} {
  func.func @kernel(%arg0: i32, %arg1: memref<8x128xf32, #tpu.memory_space<vmem>>, %arg2: memref<128x128xf32, #tpu.memory_space<vmem>>, %arg3: memref<128x128xf32, #tpu.memory_space<vmem>>, %arg4: memref<1x128xf32, #tpu.memory_space<vmem>>, %arg5: memref<1x128xf32, #tpu.memory_space<vmem>>, %arg6: memref<8x128xf32, #tpu.memory_space<vmem>>, %arg7: memref<8x128xf32, #tpu.memory_space<vmem>>) attributes {dimension_semantics = [#tpu.dimension_semantics<parallel>], iteration_bounds = array<i64: 1>, scalar_prefetch = 0 : i64, scratch_operands = 0 : i64, tpu.core_type = #tpu.core_type<tc>, window_params = [{transform_indices = @transform_0, window_bounds = array<i64: 8, 128>}, {pipeline_mode = #tpu.pipeline_mode<synchronous>, transform_indices = @transform_1, window_bounds = array<i64: 128, 128>}, {pipeline_mode = #tpu.pipeline_mode<synchronous>, transform_indices = @transform_2, window_bounds = array<i64: 128, 128>}, {pipeline_mode = #tpu.pipeline_mode<synchronous>, transform_indices = @transform_3, window_bounds = array<i64: 1, 128>}, {pipeline_mode = #tpu.pipeline_mode<synchronous>, transform_indices = @transform_4, window_bounds = array<i64: 1, 128>}, {transform_indices = @transform_5, window_bounds = array<i64: 8, 128>}, {transform_indices = @transform_6, window_bounds = array<i64: 8, 128>}]} {
    %c0 = arith.constant 0 : index
    %c0_0 = arith.constant 0 : index
    %0 = vector.load %arg1[%c0, %c0_0] : memref<8x128xf32, #tpu.memory_space<vmem>>, vector<8x128xf32>
    %c0_1 = arith.constant 0 : index
    %c0_2 = arith.constant 0 : index
    %1 = vector.load %arg2[%c0_1, %c0_2] : memref<128x128xf32, #tpu.memory_space<vmem>>, vector<128x128xf32>
    %cst = arith.constant dense<0.000000e+00> : vector<8x128xf32>
    %2 = tpu.matmul %0, %1, %cst {dimension_numbers = #tpu.dot_dimension_numbers<[1], [0], [0], [1], [0, 0, 1, 1], [], []>} : vector<8x128xf32>, vector<128x128xf32>, vector<8x128xf32> -> vector<8x128xf32>
    %c0_3 = arith.constant 0 : index
    %c0_4 = arith.constant 0 : index
    %3 = vector.load %arg4[%c0_3, %c0_4] : memref<1x128xf32, #tpu.memory_space<vmem>>, vector<1x128xf32>
    %4 = vector.broadcast %3 : vector<1x128xf32> to vector<8x128xf32>
    %5 = arith.addf %2, %4 : vector<8x128xf32>
    %cst_5 = arith.constant 0.000000e+00 : f32
    %6 = vector.broadcast %cst_5 : f32 to vector<8x128xf32>
    %7 = arith.maximumf %5, %6 : vector<8x128xf32>
    %c0_6 = arith.constant 0 : index
    %c0_7 = arith.constant 0 : index
    %8 = vector.load %arg3[%c0_6, %c0_7] : memref<128x128xf32, #tpu.memory_space<vmem>>, vector<128x128xf32>
    %cst_8 = arith.constant dense<0.000000e+00> : vector<8x128xf32>
    %9 = tpu.matmul %7, %8, %cst_8 {dimension_numbers = #tpu.dot_dimension_numbers<[1], [0], [0], [1], [0, 0, 1, 1], [], []>} : vector<8x128xf32>, vector<128x128xf32>, vector<8x128xf32> -> vector<8x128xf32>
    %c0_9 = arith.constant 0 : index
    %c0_10 = arith.constant 0 : index
    %10 = vector.load %arg5[%c0_9, %c0_10] : memref<1x128xf32, #tpu.memory_space<vmem>>, vector<1x128xf32>
    %11 = vector.broadcast %10 : vector<1x128xf32> to vector<8x128xf32>
    %12 = arith.addf %9, %11 : vector<8x128xf32>
    %cst_11 = arith.constant dense<0xFF800000> : vector<8xf32>
    %13 = vector.multi_reduction <maximumf>, %12, %cst_11 [1] : vector<8x128xf32> to vector<8xf32>
    %14 = vector.shape_cast %13 : vector<8xf32> to vector<8x1xf32>
    %15 = vector.broadcast %14 : vector<8x1xf32> to vector<8x128xf32>
    %16 = arith.subf %12, %15 : vector<8x128xf32>
    %17 = math.exp %16 : vector<8x128xf32>
    %cst_12 = arith.constant dense<0.000000e+00> : vector<8xf32>
    %18 = vector.multi_reduction <add>, %17, %cst_12 [1] : vector<8x128xf32> to vector<8xf32>
    %19 = vector.shape_cast %18 : vector<8xf32> to vector<8x1xf32>
    %20 = tpu.reciprocal %19 {approx = true} : vector<8x1xf32> -> vector<8x1xf32>
    %21 = arith.mulf %19, %20 : vector<8x1xf32>
    %cst_13 = arith.constant 2.000000e+00 : f32
    %22 = vector.broadcast %cst_13 : f32 to vector<8x1xf32>
    %23 = arith.subf %22, %21 : vector<8x1xf32>
    %24 = arith.mulf %20, %23 : vector<8x1xf32>
    %c0_14 = arith.constant 0 : index
    %c0_15 = arith.constant 0 : index
    %25 = vector.load %arg6[%c0_14, %c0_15] : memref<8x128xf32, #tpu.memory_space<vmem>>, vector<8x128xf32>
    tpu.vector_store %arg6[%c0_14, %c0_15], %16 {strides = array<i32>} : memref<8x128xf32, #tpu.memory_space<vmem>>, vector<8x128xf32>,
    %26 = vector.broadcast %24 : vector<8x1xf32> to vector<8x128xf32>
    %27 = arith.mulf %17, %26 : vector<8x128xf32>
    %c0_16 = arith.constant 0 : index
    %c0_17 = arith.constant 0 : index
    %28 = vector.load %arg7[%c0_16, %c0_17] : memref<8x128xf32, #tpu.memory_space<vmem>>, vector<8x128xf32>
    tpu.vector_store %arg7[%c0_16, %c0_17], %27 {strides = array<i32>} : memref<8x128xf32, #tpu.memory_space<vmem>>, vector<8x128xf32>,
    return
  }
  func.func @transform_0(%arg0: i32) -> (i32, i32) {
    %c0_i32 = arith.constant 0 : i32
    %c0_i32_0 = arith.constant 0 : i32
    return %arg0, %c0_i32 : i32, i32
  }
  func.func @transform_1(%arg0: i32) -> (i32, i32) {
    %c0_i32 = arith.constant 0 : i32
    %c0_i32_0 = arith.constant 0 : i32
    %c0_i32_1 = arith.constant 0 : i32
    return %c0_i32, %c0_i32_0 : i32, i32
  }
  func.func @transform_2(%arg0: i32) -> (i32, i32) {
    %c0_i32 = arith.constant 0 : i32
    %c0_i32_0 = arith.constant 0 : i32
    %c0_i32_1 = arith.constant 0 : i32
    return %c0_i32, %c0_i32_0 : i32, i32
  }
  func.func @transform_3(%arg0: i32) -> (i32, i32) {
    %c0_i32 = arith.constant 0 : i32
    %c0_i32_0 = arith.constant 0 : i32
    %c0_i32_1 = arith.constant 0 : i32
    return %c0_i32, %c0_i32_0 : i32, i32
  }
  func.func @transform_4(%arg0: i32) -> (i32, i32) {
    %c0_i32 = arith.constant 0 : i32
    %c0_i32_0 = arith.constant 0 : i32
    %c0_i32_1 = arith.constant 0 : i32
    return %c0_i32, %c0_i32_0 : i32, i32
  }
  func.func @transform_5(%arg0: i32) -> (i32, i32) {
    %c0_i32 = arith.constant 0 : i32
    %c0_i32_0 = arith.constant 0 : i32
    return %arg0, %c0_i32 : i32, i32
  }
  func.func @transform_6(%arg0: i32) -> (i32, i32) {
    %c0_i32 = arith.constant 0 : i32
    %c0_i32_0 = arith.constant 0 : i32
    return %arg0, %c0_i32 : i32, i32
  }
}

</mosaic_0001>

<bundles_post_ra>
// kernel: tpu_custom_call.1
= control target key start
LH: loop header
LB: loop body
LE: loop exit
PB: predicated region body
PF: predicated region fallthrough
CT: control target
= control target key end

     0   :  { %12 = vsyncpa [#allocation3], 0  ;;  %s403_s0 = inlined_call_operand.hbm [shape: f32[8,128], index: 0, kind: input, shape index: {}]   ;;  %s404_s1 = inlined_call_operand.hbm [shape: f32[128,128], index: 1, kind: input, shape index: {}]   ;;  %s405_s2 = inlined_call_operand.hbm [shape: f32[128,128], index: 2, kind: input, shape index: {}]   ;;  %s406_s3 = inlined_call_operand.vmem [shape: f32[1,128], index: 3, kind: input, shape index: {}]   ;;  %s407_s4 = inlined_call_operand.vmem [shape: f32[1,128], index: 4, kind: input, shape index: {}]   ;;  %s408_s5 = inlined_call_operand.hbm [shape: f32[8,128], index: 5, kind: output, shape index: {0}]   ;;  %s409_s6 = inlined_call_operand.hbm [shape: f32[8,128], index: 6, kind: output, shape index: {1}]  }
   0x1   :  { %13 = vsyncpa [#allocation6], 0 }
   0x2   :  { %14 = vsyncpa [#allocation4], 0  ;;  %s31_s23 = sshll.u32 %s404_s1, 4  ;;  %s32_s23 = int_to_ptr.hbm [resolvable:$true] %s31_s23 }
   0x3   :  { %15 = vsyncpa [#allocation10], 0  ;;  %s340_s24 = smov [#allocation5]   ;;  %s21_s28 = sshll.u32 %s403_s0, 4  ;;  %s22_s28 = int_to_ptr.hbm [resolvable:$true] %s21_s28 }
   0x4   :  { %s33_s25 = sshll.u32 %s340_s24, 4  ;;  %s341_s29 = smov 128   ;;  %s34_s25 = int_to_ptr.vmem [resolvable:$true] %s33_s25 }
   0x5   :  { %s342_s30 = smov 8   ;;  %s343_s7 = smov [#allocation2]  }
   0x6   :  { %39 = dma.hbm_to_vmem [thread:$0]  %s32_s23, 2048, %s34_s25, [#allocation6], %s341_s29, %s341_s29, %s342_s30  }
   0x7   :  { %s23_s8 = sshll.u32 %s343_s7, 4  ;;  %s44_s11 = sshll.u32 %s405_s2, 4  ;;  %s24_s8 = int_to_ptr.vmem [resolvable:$true] %s23_s8  ;;  %s45_s11 = int_to_ptr.hbm [resolvable:$true] %s44_s11 }
   0x8   :  { %26 = dma.hbm_to_vmem [thread:$0]  %s22_s28, 128, %s24_s8, [#allocation3]  }
   0x9   :  { %s344_s1 = smov [#allocation7]  }
   0xa   :  { %s46_s12 = sshll.u32 %s344_s1, 4  ;;  %s47_s12 = int_to_ptr.vmem [resolvable:$true] %s46_s12 }
   0xb   :  { %52 = dma.hbm_to_vmem [thread:$0]  %s45_s11, 2048, %s47_s12, [#allocation6], %s341_s29, %s341_s29, %s342_s30  }
   0xc   :  { %332 = dma.done.wait [#allocation3], 128  }
   0xd   :  { %333 = vsyncadd [#allocation3], 4294967168 }
   0xe   :  { %334 = dma.done.wait [#allocation6], 4096  }
   0xf   :  { %335 = vsyncadd [#allocation6], 4294963200  ;;  %v85_v0 = vld [vmem:[#allocation5 + $0x78] sm:$0xff]  ;;  %v84_v1 = vld [vmem:[#allocation5 + $0x70] sm:$0xff]  ;;  %s345_s15 = smov [#allocation8]   ;;  %s172_s18 = sshll.u32 %s408_s5, 4  ;;  %s173_s18 = int_to_ptr.hbm [resolvable:$true] %s172_s18 }
  0x10   :  { %90 = vmatpush.msra.mxu0 %v85_v0  ;;  %v83_v2 = vld [vmem:[#allocation5 + $0x68] sm:$0xff]  ;;  %v82_v3 = vld [vmem:[#allocation5 + $0x60] sm:$0xff]  ;;  %v126_v4 = vld [vmem:[#allocation7 + $0x78] sm:$0xff]  ;;  %s183_s22 = sshll.u32 %s409_s6, 4  ;;  %s184_s22 = int_to_ptr.hbm [resolvable:$true] %s183_s22 }
  0x11   :  { %v81_v5 = vld [vmem:[#allocation5 + $0x58] sm:$0xff]  ;;  %131 = vmatpush.msra.mxu1 %v126_v4  ;;  %v125_v6 = vld [vmem:[#allocation7 + $0x70] sm:$0xff]  ;;  %v124_v7 = vld [vmem:[#allocation7 + $0x68] sm:$0xff] }
  0x12   :  { %91 = vmatpush.msra.mxu0 %v84_v1  ;;  %v80_v8 = vld [vmem:[#allocation5 + $0x50] sm:$0xff]  ;;  %v123_v9 = vld [vmem:[#allocation7 + $0x60] sm:$0xff]  ;;  %v79_v10 = vld [vmem:[#allocation5 + $0x48] sm:$0xff] }
  0x13   :  { %132 = vmatpush.msra.mxu1 %v125_v6  ;;  %v122_v11 = vld [vmem:[#allocation7 + $0x58] sm:$0xff]  ;;  %v78_v12 = vld [vmem:[#allocation5 + $0x40] sm:$0xff]  ;;  %v121_v13 = vld [vmem:[#allocation7 + $0x50] sm:$0xff] }
  0x14   :  { %92 = vmatpush.msra.mxu0 %v83_v2  ;;  %v77_v14 = vld [vmem:[#allocation5 + $0x38] sm:$0xff]  ;;  %v120_v15 = vld [vmem:[#allocation7 + $0x48] sm:$0xff]  ;;  %v76_v16 = vld [vmem:[#allocation5 + $0x30] sm:$0xff] }
  0x15   :  { %133 = vmatpush.msra.mxu1 %v124_v7  ;;  %v119_v17 = vld [vmem:[#allocation7 + $0x40] sm:$0xff]  ;;  %v75_v18 = vld [vmem:[#allocation5 + $0x28] sm:$0xff]  ;;  %v118_v19 = vld [vmem:[#allocation7 + $0x38] sm:$0xff] }
  0x16   :  { %93 = vmatpush.msra.mxu0 %v82_v3  ;;  %v74_v20 = vld [vmem:[#allocation5 + $0x20] sm:$0xff]  ;;  %v117_v21 = vld [vmem:[#allocation7 + $0x30] sm:$0xff]  ;;  %v73_v22 = vld [vmem:[#allocation5 + $0x18] sm:$0xff] }
  0x17   :  { %134 = vmatpush.msra.mxu1 %v123_v9  ;;  %v116_v23 = vld [vmem:[#allocation7 + $0x28] sm:$0xff]  ;;  %v72_v24 = vld [vmem:[#allocation5 + $0x10] sm:$0xff]  ;;  %v115_v25 = vld [vmem:[#allocation7 + $0x20] sm:$0xff] }
  0x18   :  { %94 = vmatpush.msra.mxu0 %v81_v5  ;;  %v71_v26 = vld [vmem:[#allocation5 + $0x8] sm:$0xff]  ;;  %v114_v27 = vld [vmem:[#allocation7 + $0x18] sm:$0xff]  ;;  %v70_v28 = vld [vmem:[#allocation5] sm:$0xff] }
  0x19   :  { %135 = vmatpush.msra.mxu1 %v122_v11  ;;  %v69_v29 = vld [vmem:[#allocation2] sm:$0xff]  ;;  %v113_v30 = vld [vmem:[#allocation7 + $0x10] sm:$0xff]  ;;  %v112_v31 = vld [vmem:[#allocation7 + $0x8] sm:$0xff] }
  0x1a   :  { %95 = vmatpush.msra.mxu0 %v80_v8  ;;  %v111_v32 = vld [vmem:[#allocation7] sm:$0xff]  ;;  %v206_v33 = vld [vmem:[%s406_s3] ss:$0 sm:$0xff]  ;;  %s170_s3 = sshll.u32 %s345_s15, 4  ;;  %s171_s3 = int_to_ptr.vmem [resolvable:$true] %s170_s3 }
  0x1b   :  { %136 = vmatpush.msra.mxu1 %v121_v13  ;;  %v207_v37 = vld [vmem:[%s407_s4] ss:$0 sm:$0xff]  ;;  %s346_s4 = smov [#allocation9]  }
  0x1c   :  { %96 = vmatpush.msra.mxu0 %v79_v10  ;;  %s181_s19 = sshll.u32 %s346_s4, 4  ;;  %s182_s19 = int_to_ptr.vmem [resolvable:$true] %s181_s19 }
  0x1d   :  { %137 = vmatpush.msra.mxu1 %v120_v15 }
  0x1e   :  { %97 = vmatpush.msra.mxu0 %v78_v12 }
  0x1f   :  { %138 = vmatpush.msra.mxu1 %v119_v17 }
  0x20   :  { %98 = vmatpush.msra.mxu0 %v77_v14 }
  0x21   :  { %139 = vmatpush.msra.mxu1 %v118_v19 }
  0x22   :  { %99 = vmatpush.msra.mxu0 %v76_v16 }
  0x23   :  { %140 = vmatpush.msra.mxu1 %v117_v21 }
  0x24   :  { %100 = vmatpush.msra.mxu0 %v75_v18 }
  0x25   :  { %141 = vmatpush.msra.mxu1 %v116_v23 }
  0x26   :  { %101 = vmatpush.msra.mxu0 %v74_v20 }
  0x27   :  { %142 = vmatpush.msra.mxu1 %v115_v25 }
  0x28   :  { %102 = vmatpush.msra.mxu0 %v73_v22 }
  0x29   :  { %143 = vmatpush.msra.mxu1 %v114_v27 }
  0x2a   :  { %103 = vmatpush.msra.mxu0 %v72_v24 }
  0x2b   :  { %144 = vmatpush.msra.mxu1 %v113_v30 }
  0x2c   :  { %104 = vmatpush.msra.mxu0 %v71_v26 }
  0x2d   :  { %145 = vmatpush.msra.mxu1 %v112_v31 }
  0x2e   :  { %105 = vmatpush.msra.mxu0 %v70_v28 }
  0x2f   :  { %106 = vmatmul.f32.vlgmr.msra.gmra.mxu0 %v69_v29  ;;  %146 = vmatpush.msra.mxu1 %v111_v32 }
  0xac   :  { %v107_v34 = vpop.f32.mrf.mxu0 }
  0xad   :  { %v108_v35 = vadd.f32 %v206_v33, %v107_v34 }
  0xaf   :  { %v110_v36 = vmax.f32 %v108_v35, 0.0 }
  0xb1   :  { %147 = vmatmul.f32.vlgmr.msra.gmra.mxu1 %v110_v36 }
 0x12e   :  { %v148_v38 = vpop.f32.mrf.mxu1 }
 0x12f   :  { %v149_v39 = vadd.f32 %v207_v37, %v148_v38 }
 0x131   :  { %151 = vmax.xlane.f32.xlu0 %v149_v39 }
 0x1a4   :  { %v152_v40 = vpop.xlane.xlu0 %151 }
 0x1a5   :  { %v153_v41 = vsub.f32 %v149_v39, %v152_v40 }
 0x1a7   :  { %v154_v42 = vmul.f32 1.442695, %v153_v41  ;;  %162 = vst [vmem:[#allocation8] sm:$0xff] %v153_v41 }
 0x1a8   :  { %175 = dma.vmem_to_hbm [thread:$0]  %s171_s3, 128, %s173_s18, [#allocation4]  }
 0x1a9   :  { %208 = vpow2.f32 %v154_v42 }
 0x1af   :  { %v209_v43 = vpop.eup %208 }
 0x1b0   :  { %156 = vadd.xlane.f32.xlu0 %v209_v43 }
 0x223   :  { %v157_v44 = vpop.xlane.xlu0 %156 }
 0x224   :  { %210 = vrcp.f32 %v157_v44 }
 0x22a   :  { %v211_v45 = vpop.eup %210 }
 0x22b   :  { %v159_v46 = vmul.f32 %v211_v45, %v157_v44 }
 0x22d   :  { %v160_v47 = vsub.f32 2.0, %v159_v46 }
 0x22f   :  { %v161_v48 = vmul.f32 %v211_v45, %v160_v47 }
 0x231   :  { %v163_v49 = vmul.f32 %v209_v43, %v161_v48 }
 0x233   :  { %164 = vst [vmem:[#allocation9] sm:$0xff] %v163_v49 }
 0x234   :  { %186 = dma.vmem_to_hbm [thread:$0]  %s182_s19, 128, %s184_s22, [#allocation10]  }
 0x235   :  { %336 = dma.done.wait [#allocation4], 128  }
 0x236   :  { %337 = vsyncadd [#allocation4], 4294967168 }
 0x237   :  { %338 = dma.done.wait [#allocation10], 128  }
 0x238   :  { %339 = vsyncadd [#allocation10], 4294967168 }
 0x239   :  { %195 = vsyncpa [#allocation3], 1 }
 0x23a   :  { %196 = vsyncpa [#allocation6], 1 }
 0x23b   :  { %197 = vsyncpa [#allocation4], 1 }
 0x23c   :  { %198 = vsyncpa [#allocation10], 1 }

</bundles_post_ra>
